<compile_context>
chip_gen: v7x
topology: tpu7x:2x2x1
jax: 0.10.0
libtpu: 0.0.40
codegen_flags: <defaults>
</compile_context>

<pallas_src>
import jax
import jax.numpy as jnp
from jax.experimental import pallas as pl
from jax.experimental.pallas import tpu as pltpu


def _make_expert_mlp_kernel(single_f_step, gelu_approximate):
    """Grid = (row_tiles, F_tiles); each row tile belongs to exactly one expert."""

    def _gelu(h):
        if gelu_approximate:
            return jax.nn.gelu(h, approximate=True)        # tanh -> EUP slot
        # exact erf-based GELU (torch.nn.functional.gelu default), f32
        return 0.5 * h * (1.0 + jax.lax.erf(h * 0.7071067811865476))

    if single_f_step:
        # Whole expert W1/W2 resident per step: no accumulator scratch needed.
        def kernel(te_ref, cnt_ref, x_ref, gate_ref, w1_ref, b1_ref, w2_ref,
                   b2_ref, out_ref):
            del te_ref                                      # used in index_maps only
            i = pl.program_id(0)
            has_work = cnt_ref[i] > 0

            @pl.when(has_work)
            def _():
                h = jnp.dot(x_ref[...], w1_ref[0],
                            preferred_element_type=jnp.float32) + b1_ref[0]
                h = _gelu(h)
                y = jnp.dot(h.astype(w2_ref.dtype), w2_ref[0],
                            preferred_element_type=jnp.float32) + b2_ref[0]
                out_ref[...] = (gate_ref[...] * y).astype(out_ref.dtype)

            @pl.when(jnp.logical_not(has_work))
            def _():
                # fully padded trailing tile: rows are never read back, but
                # write zeros so the output buffer never holds stale garbage.
                out_ref[...] = jnp.zeros_like(out_ref)

        return kernel

    def kernel(te_ref, cnt_ref, x_ref, gate_ref, w1_ref, b1_ref, w2_ref,
               b2_ref, out_ref, acc_ref):
        del te_ref
        i = pl.program_id(0)
        f = pl.program_id(1)
        has_work = cnt_ref[i] > 0

        @pl.when(f == 0)
        def _():
            acc_ref[...] = jnp.zeros_like(acc_ref)

        @pl.when(has_work)
        def _():
            h = jnp.dot(x_ref[...], w1_ref[0],
                        preferred_element_type=jnp.float32) + b1_ref[0]
            h = _gelu(h)
            acc_ref[...] += jnp.dot(h.astype(w2_ref.dtype), w2_ref[0],
                                    preferred_element_type=jnp.float32)

        @pl.when(f == pl.num_programs(1) - 1)
        def _():
            y = acc_ref[...] + b2_ref[0]                    # (tT, H) f32
            out_ref[...] = (gate_ref[...] * y).astype(out_ref.dtype)

    return kernel


def moe_block(x, wr, w1, b1, w2, b2, bias, *, top_k,
              token_tile=None, f_tile=None,
              compute_dtype=jnp.bfloat16, out_dtype=None,
              gelu_approximate=False, vmem_limit_bytes=None):
    """x: (B, S, H). Returns (results (B,S,H), router_logits (B*S, E))."""
    B, S, H = x.shape
    T = B * S
    E = wr.shape[1]
    F = w1.shape[-1]

    if token_tile is None:
        token_tile = 256                    # MXU-friendly default (v6e/v7x); >=128 on v5e
    tT = token_tile
    tF = f_tile or F                        # tF=F keeps whole expert weights resident
    if out_dtype is None:
        out_dtype = compute_dtype

    sublane = 16 if jnp.dtype(compute_dtype).itemsize == 2 else 8
    assert tT % sublane == 0, f"token_tile must be a multiple of {sublane} for {compute_dtype}"
    assert F % tF == 0 and (tF == F or tF % 128 == 0), "f_tile must be lane-aligned"
    # H is used as a full-extent block dim everywhere; prefer a multiple of 128
    # (pad in the caller for real configs), small H still compiles.

    xt = x.reshape(T, H).astype(jnp.float32)

    # ---- router (tiny matmul, left to XLA) + top-k gating -------------------
    router_logits = xt @ wr                                          # (T, E) f32
    probs = jax.nn.softmax(router_logits, axis=-1)
    gate_vals, expert_idx = jax.lax.top_k(probs, top_k)              # (T, K)

    # ---- bucket assignments by expert, pad each group to the token tile -----
    A = T * top_k
    tok_ids = jnp.repeat(jnp.arange(T, dtype=jnp.int32), top_k)      # (A,)
    flat_expert = expert_idx.reshape(A).astype(jnp.int32)
    flat_gate = gate_vals.reshape(A).astype(jnp.float32)

    order = jnp.argsort(flat_expert)
    sorted_expert = flat_expert[order]
    sorted_tok = tok_ids[order]
    sorted_gate = flat_gate[order]

    group_sizes = jnp.zeros((E,), jnp.int32).at[flat_expert].add(1)
    group_starts = jnp.cumsum(group_sizes) - group_sizes             # exclusive
    padded_sizes = ((group_sizes + tT - 1) // tT) * tT
    padded_ends = jnp.cumsum(padded_sizes)
    padded_starts = padded_ends - padded_sizes

    rank = jnp.arange(A, dtype=jnp.int32) - group_starts[sorted_expert]
    dest = padded_starts[sorted_expert] + rank                       # (A,) unique rows

    # static upper bound on total padded rows: sum_e ceil(n_e/tT) <= A//tT + E
    R = (A // tT + E) * tT
    n_row_tiles = R // tT
    n_f_tiles = F // tF
    single_f = (n_f_tiles == 1)

    x_buf = jnp.zeros((R, H), compute_dtype).at[dest].set(
        xt[sorted_tok].astype(compute_dtype))
    gate_buf = jnp.zeros((R, 1), jnp.float32).at[dest].set(sorted_gate[:, None])

    # ---- per-row-tile expert id + valid-row count (scalar prefetch) ---------
    tile_starts = jnp.arange(n_row_tiles, dtype=jnp.int32) * tT
    tile_expert = jnp.searchsorted(padded_ends, tile_starts, side='right')
    tile_expert = jnp.minimum(tile_expert, E - 1).astype(jnp.int32)
    row_valid = jnp.zeros((R,), jnp.int32).at[dest].set(1)
    tile_count = row_valid.reshape(n_row_tiles, tT).sum(axis=1).astype(jnp.int32)
    # Empty tiles only exist as a trailing run; give them the last active
    # tile's expert so their (frozen) weight block index matches the previous
    # grid step => no extra weight DMA for them.
    n_used = padded_ends[-1] // tT
    last_expert = tile_expert[jnp.maximum(n_used - 1, 0)]
    tile_expert = jnp.where(tile_count > 0, tile_expert, last_expert).astype(jnp.int32)

    nf = n_f_tiles

    def _f_eff(f, cnt_i):
        # valid tile: advance with f; empty tile: stay on the last fetched block
        has = jnp.minimum(cnt_i, 1)
        return f * has + (nf - 1) * (1 - has)

    def x_map(i, f, te, cnt):    return (i, 0)
    def gate_map(i, f, te, cnt): return (i, 0)
    def w1_map(i, f, te, cnt):   return (te[i], 0, _f_eff(f, cnt[i]))
    def b1_map(i, f, te, cnt):   return (te[i], 0, _f_eff(f, cnt[i]))
    def w2_map(i, f, te, cnt):   return (te[i], _f_eff(f, cnt[i]), 0)
    def b2_map(i, f, te, cnt):   return (te[i], 0, 0)
    def out_map(i, f, te, cnt):  return (i, 0)

    csize = jnp.dtype(compute_dtype).itemsize
    osize = jnp.dtype(out_dtype).itemsize
    if vmem_limit_bytes is None:
        # double-buffered block working set + accumulator + slack
        blk = (tT * H * csize + tT * 4 + H * tF * csize + tF * 4
               + tF * H * csize + H * 4 + tT * H * osize)
        est = 2 * blk + (0 if single_f else tT * H * 4) + (1 << 20)
        vmem_limit_bytes = max(est, 32 * 1024 * 1024)
        # NOTE: on v7x keep the tile plan under ~56 MiB; on v5e/v6e up to ~100 MiB is fine.

    cost = pl.CostEstimate(
        flops=4 * R * H * F,
        transcendentals=R * F,
        bytes_accessed=R * H * (csize + osize) + n_row_tiles * 2 * H * F * csize,
    )

    scratch = [] if single_f else [pltpu.VMEM((tT, H), jnp.float32)]
    kernel = _make_expert_mlp_kernel(single_f, gelu_approximate)

    # ---- grouped expert MLP in Pallas ---------------------------------------
    y_buf = pl.pallas_call(
        kernel,
        out_shape=jax.ShapeDtypeStruct((R, H), out_dtype),
        grid_spec=pltpu.PrefetchScalarGridSpec(
            num_scalar_prefetch=2,
            grid=(n_row_tiles, n_f_tiles),
            in_specs=[
                pl.BlockSpec((tT, H), x_map),                  # token rows (bf16)
                pl.BlockSpec((tT, 1), gate_map),               # per-row gate (f32)
                pl.BlockSpec((1, H, tF), w1_map),              # W1[e] tile
                pl.BlockSpec((1, 1, tF), b1_map),              # b1[e] tile
                pl.BlockSpec((1, tF, H), w2_map),              # W2[e] tile
                pl.BlockSpec((1, 1, H), b2_map),               # b2[e]
            ],
            out_specs=pl.BlockSpec((tT, H), out_map),
            scratch_shapes=scratch,
        ),
        compiler_params=pltpu.CompilerParams(
            dimension_semantics=("parallel", "arbitrary"),
            vmem_limit_bytes=vmem_limit_bytes),
        cost_estimate=cost,
    )(tile_expert, tile_count, x_buf, gate_buf,
      w1.astype(compute_dtype), b1.astype(jnp.float32),
      w2.astype(compute_dtype), b2.astype(jnp.float32))

    # ---- scatter-add weighted expert outputs back to tokens (f32), add bias -
    results = jnp.zeros((T, H), jnp.float32).at[sorted_tok].add(
        y_buf[dest].astype(jnp.float32))
    results = results + bias.reshape(1, H)
    return results.astype(x.dtype).reshape(B, S, H), router_logits


def moe_ref(x, wr, w1, b1, w2, b2, bias, *, top_k):
    """Pure-JAX f32 reference mirroring the PyTorch forward (attention_mask=None)."""
    B, S, H = x.shape
    xt = x.reshape(-1, H).astype(jnp.float32)
    logits = xt @ wr
    probs = jax.nn.softmax(logits, axis=-1)
    w_top, idx = jax.lax.top_k(probs, top_k)
    E = wr.shape[1]
    out = jnp.zeros_like(xt)
    for e in range(E):
        gate = jnp.sum(jnp.where(idx == e, w_top, 0.0), axis=-1, keepdims=True)
        h = jax.nn.gelu(xt @ w1[e] + b1[e, 0], approximate=False)
        y = h @ w2[e] + b2[e, 0]
        out = out + gate * y
    out = out + bias.reshape(1, H)
    return out.reshape(B, S, H), logits


if __name__ == "__main__":
    # small config consistent with the module:
    # hidden_size = n_embd = 32, n_inner = 256, num_experts = 8, top_k = 2
    B, S, H, F, E, TOP_K = 2, 8, 32, 256, 8, 2

    key = jax.random.PRNGKey(0)
    k_x, k_wr, k_w1, k_b1, k_w2, k_b2 = jax.random.split(key, 6)

    x = jax.random.normal(k_x, (B, S, H), dtype=jnp.float32)
    wr = jax.random.normal(k_wr, (H, E), dtype=jnp.float32) * 0.1
    w1 = jax.random.normal(k_w1, (E, H, F), dtype=jnp.float32) * 0.1
    b1 = jax.random.normal(k_b1, (E, 1, F), dtype=jnp.float32) * 0.05
    w2 = jax.random.normal(k_w2, (E, F, H), dtype=jnp.float32) * 0.1
    b2 = jax.random.normal(k_b2, (E, 1, H), dtype=jnp.float32) * 0.05
    bias = jnp.zeros((H,), dtype=jnp.float32)   # nn.Parameter(torch.zeros(H))

    out_ref, logits_ref = moe_ref(x, wr, w1, b1, w2, b2, bias, top_k=TOP_K)

    # demo uses a tiny token tile (real configs: leave token_tile=None -> 256)
    # 1) whole-expert weights resident (tF = F, no accumulator scratch)
    out1, logits1 = moe_block(x, wr, w1, b1, w2, b2, bias,
                              top_k=TOP_K, token_tile=16)
    # 2) F tiled on the reduction grid axis with a f32 VMEM accumulator
    out2, logits2 = moe_block(x, wr, w1, b1, w2, b2, bias,
                              top_k=TOP_K, token_tile=16, f_tile=128)
    jax.block_until_ready((out1, out2, logits1, logits2))

    for out, logits in ((out1, logits1), (out2, logits2)):
        assert jnp.allclose(logits, logits_ref, rtol=1e-5, atol=1e-5), "logits mismatch"
        # bf16 expert matmuls / bf16 kernel output vs. f32 reference -> loose tol
        assert jnp.allclose(out, out_ref, rtol=3e-2, atol=3e-2), "output mismatch"

    print("KERNEL_OK")
</pallas_src>

<mosaic_0001>
module attributes {stable_mosaic.version = 11 : i64} {
  func.func @kernel(%arg0: i32, %arg1: i32, %arg2: memref<10xi32, #tpu.memory_space<smem>>, %arg3: memref<10xi32, #tpu.memory_space<smem>>, %arg4: memref<16x32xbf16, #tpu.memory_space<vmem>>, %arg5: memref<16x1xf32, #tpu.memory_space<vmem>>, %arg6: memref<1x32x256xbf16, #tpu.memory_space<vmem>>, %arg7: memref<1x1x256xf32, #tpu.memory_space<vmem>>, %arg8: memref<1x256x32xbf16, #tpu.memory_space<vmem>>, %arg9: memref<1x1x32xf32, #tpu.memory_space<vmem>>, %arg10: memref<16x32xbf16, #tpu.memory_space<vmem>>) attributes {dimension_semantics = [#tpu.dimension_semantics<parallel>, #tpu.dimension_semantics<arbitrary>], iteration_bounds = array<i64: 10, 1>, scalar_prefetch = 2 : i64, scratch_operands = 0 : i64, tpu.core_type = #tpu.core_type<tc>, window_params = [{transform_indices = @transform_0, window_bounds = array<i64: 16, 32>}, {transform_indices = @transform_1, window_bounds = array<i64: 16, 1>}, {transform_indices = @transform_2, window_bounds = array<i64: 1, 32, 256>}, {transform_indices = @transform_3, window_bounds = array<i64: 1, 1, 256>}, {transform_indices = @transform_4, window_bounds = array<i64: 1, 256, 32>}, {transform_indices = @transform_5, window_bounds = array<i64: 1, 1, 32>}, {transform_indices = @transform_6, window_bounds = array<i64: 16, 32>}]} {
    %0 = arith.index_cast %arg0 : i32 to index
    %1 = memref.load %arg3[%0] : memref<10xi32, #tpu.memory_space<smem>>
    %c0_i32 = arith.constant 0 : i32
    %2 = arith.cmpi sgt, %1, %c0_i32 : i32
    %3 = arith.extui %2 : i1 to i32
    %c0_i32_0 = arith.constant 0 : i32
    %4 = arith.cmpi ne, %3, %c0_i32_0 : i32
    scf.if %4 {
      %c0 = arith.constant 0 : index
      %c0_2 = arith.constant 0 : index
      %8 = vector.load %arg4[%c0, %c0_2] : memref<16x32xbf16, #tpu.memory_space<vmem>>, vector<16x32xbf16>
      %c0_3 = arith.constant 0 : index
      %c0_4 = arith.constant 0 : index
      %c0_5 = arith.constant 0 : index
      %9 = vector.load %arg6[%c0_3, %c0_4, %c0_5] : memref<1x32x256xbf16, #tpu.memory_space<vmem>>, vector<1x32x256xbf16>
      %10 = vector.shape_cast %9 : vector<1x32x256xbf16> to vector<32x256xbf16>
      %cst = arith.constant dense<0.000000e+00> : vector<16x256xf32>
      %11 = tpu.matmul %8, %10, %cst {dimension_numbers = #tpu.dot_dimension_numbers<[1], [0], [0], [1], [0, 0, 1, 1], [], []>} : vector<16x32xbf16>, vector<32x256xbf16>, vector<16x256xf32> -> vector<16x256xf32>
      %c0_6 = arith.constant 0 : index
      %c0_7 = arith.constant 0 : index
      %c0_8 = arith.constant 0 : index
      %12 = vector.load %arg7[%c0_6, %c0_7, %c0_8] : memref<1x1x256xf32, #tpu.memory_space<vmem>>, vector<1x1x256xf32>
      %13 = vector.shape_cast %12 : vector<1x1x256xf32> to vector<1x256xf32>
      %14 = vector.broadcast %13 : vector<1x256xf32> to vector<16x256xf32>
      %15 = arith.addf %11, %14 : vector<16x256xf32>
      %cst_9 = arith.constant 5.000000e-01 : f32
      %16 = vector.broadcast %cst_9 : f32 to vector<16x256xf32>
      %17 = arith.mulf %16, %15 : vector<16x256xf32>
      %cst_10 = arith.constant 0.707106769 : f32
      %18 = vector.broadcast %cst_10 : f32 to vector<16x256xf32>
      %19 = arith.mulf %15, %18 : vector<16x256xf32>
      %20 = math.erf %19 : vector<16x256xf32>
      %cst_11 = arith.constant 1.000000e+00 : f32
      %21 = vector.broadcast %cst_11 : f32 to vector<16x256xf32>
      %22 = arith.addf %21, %20 : vector<16x256xf32>
      %23 = arith.mulf %17, %22 : vector<16x256xf32>
      %24 = arith.truncf %23 : vector<16x256xf32> to vector<16x256xbf16>
      %c0_12 = arith.constant 0 : index
      %c0_13 = arith.constant 0 : index
      %c0_14 = arith.constant 0 : index
      %25 = vector.load %arg8[%c0_12, %c0_13, %c0_14] : memref<1x256x32xbf16, #tpu.memory_space<vmem>>, vector<1x256x32xbf16>
      %26 = vector.shape_cast %25 : vector<1x256x32xbf16> to vector<256x32xbf16>
      %cst_15 = arith.constant dense<0.000000e+00> : vector<16x32xf32>
      %27 = tpu.matmul %24, %26, %cst_15 {dimension_numbers = #tpu.dot_dimension_numbers<[1], [0], [0], [1], [0, 0, 1, 1], [], []>} : vector<16x256xbf16>, vector<256x32xbf16>, vector<16x32xf32> -> vector<16x32xf32>
      %c0_16 = arith.constant 0 : index
      %c0_17 = arith.constant 0 : index
      %c0_18 = arith.constant 0 : index
      %28 = vector.load %arg9[%c0_16, %c0_17, %c0_18] : memref<1x1x32xf32, #tpu.memory_space<vmem>>, vector<1x1x32xf32>
      %29 = vector.shape_cast %28 : vector<1x1x32xf32> to vector<1x32xf32>
      %30 = vector.broadcast %29 : vector<1x32xf32> to vector<16x32xf32>
      %31 = arith.addf %27, %30 : vector<16x32xf32>
      %c0_19 = arith.constant 0 : index
      %c0_20 = arith.constant 0 : index
      %32 = vector.load %arg5[%c0_19, %c0_20] : memref<16x1xf32, #tpu.memory_space<vmem>>, vector<16x1xf32>
      %33 = vector.broadcast %32 : vector<16x1xf32> to vector<16x32xf32>
      %34 = arith.mulf %33, %31 : vector<16x32xf32>
      %35 = arith.truncf %34 : vector<16x32xf32> to vector<16x32xbf16>
      %c0_21 = arith.constant 0 : index
      %c0_22 = arith.constant 0 : index
      %36 = vector.load %arg10[%c0_21, %c0_22] : memref<16x32xbf16, #tpu.memory_space<vmem>>, vector<16x32xbf16>
      tpu.vector_store %arg10[%c0_21, %c0_22], %35 {strides = array<i32>} : memref<16x32xbf16, #tpu.memory_space<vmem>>, vector<16x32xbf16>,
    } else {
    }
    %true = arith.constant true
    %5 = arith.xori %2, %true : i1
    %6 = arith.extui %5 : i1 to i32
    %c0_i32_1 = arith.constant 0 : i32
    %7 = arith.cmpi ne, %6, %c0_i32_1 : i32
    scf.if %7 {
      %cst = arith.constant 0.000000e+00 : bf16
      %8 = vector.broadcast %cst : bf16 to vector<16x32xbf16>
      %c0 = arith.constant 0 : index
      %c0_2 = arith.constant 0 : index
      %9 = vector.load %arg10[%c0, %c0_2] : memref<16x32xbf16, #tpu.memory_space<vmem>>, vector<16x32xbf16>
      tpu.vector_store %arg10[%c0, %c0_2], %8 {strides = array<i32>} : memref<16x32xbf16, #tpu.memory_space<vmem>>, vector<16x32xbf16>,
    } else {
    }
    return
  }
  func.func @transform_0(%arg0: i32, %arg1: i32, %arg2: memref<10xi32, #tpu.memory_space<smem>>, %arg3: memref<10xi32, #tpu.memory_space<smem>>) -> (i32, i32) {
    %c0_i32 = arith.constant 0 : i32
    %c0_i32_0 = arith.constant 0 : i32
    return %arg0, %c0_i32 : i32, i32
  }
  func.func @transform_1(%arg0: i32, %arg1: i32, %arg2: memref<10xi32, #tpu.memory_space<smem>>, %arg3: memref<10xi32, #tpu.memory_space<smem>>) -> (i32, i32) {
    %c0_i32 = arith.constant 0 : i32
    %c0_i32_0 = arith.constant 0 : i32
    return %arg0, %c0_i32 : i32, i32
  }
  func.func @transform_2(%arg0: i32, %arg1: i32, %arg2: memref<10xi32, #tpu.memory_space<smem>>, %arg3: memref<10xi32, #tpu.memory_space<smem>>) -> (i32, i32, i32) {
    %0 = arith.index_cast %arg0 : i32 to index
    %1 = memref.load %arg2[%0] : memref<10xi32, #tpu.memory_space<smem>>
    %2 = arith.index_cast %arg0 : i32 to index
    %3 = memref.load %arg3[%2] : memref<10xi32, #tpu.memory_space<smem>>
    %c1_i32 = arith.constant 1 : i32
    %4 = arith.minsi %3, %c1_i32 : i32
    %5 = arith.muli %arg1, %4 : i32
    %c1_i32_0 = arith.constant 1 : i32
    %6 = arith.subi %c1_i32_0, %4 : i32
    %c0_i32 = arith.constant 0 : i32
    %7 = arith.muli %c0_i32, %6 : i32
    %8 = arith.addi %5, %7 : i32
    %c0_i32_1 = arith.constant 0 : i32
    %c0_i32_2 = arith.constant 0 : i32
    return %1, %c0_i32_1, %8 : i32, i32, i32
  }
  func.func @transform_3(%arg0: i32, %arg1: i32, %arg2: memref<10xi32, #tpu.memory_space<smem>>, %arg3: memref<10xi32, #tpu.memory_space<smem>>) -> (i32, i32, i32) {
    %0 = arith.index_cast %arg0 : i32 to index
    %1 = memref.load %arg2[%0] : memref<10xi32, #tpu.memory_space<smem>>
    %2 = arith.index_cast %arg0 : i32 to index
    %3 = memref.load %arg3[%2] : memref<10xi32, #tpu.memory_space<smem>>
    %c1_i32 = arith.constant 1 : i32
    %4 = arith.minsi %3, %c1_i32 : i32
    %5 = arith.muli %arg1, %4 : i32
    %c1_i32_0 = arith.constant 1 : i32
    %6 = arith.subi %c1_i32_0, %4 : i32
    %c0_i32 = arith.constant 0 : i32
    %7 = arith.muli %c0_i32, %6 : i32
    %8 = arith.addi %5, %7 : i32
    %c0_i32_1 = arith.constant 0 : i32
    %c0_i32_2 = arith.constant 0 : i32
    return %1, %c0_i32_1, %8 : i32, i32, i32
  }
  func.func @transform_4(%arg0: i32, %arg1: i32, %arg2: memref<10xi32, #tpu.memory_space<smem>>, %arg3: memref<10xi32, #tpu.memory_space<smem>>) -> (i32, i32, i32) {
    %0 = arith.index_cast %arg0 : i32 to index
    %1 = memref.load %arg2[%0] : memref<10xi32, #tpu.memory_space<smem>>
    %2 = arith.index_cast %arg0 : i32 to index
    %3 = memref.load %arg3[%2] : memref<10xi32, #tpu.memory_space<smem>>
    %c1_i32 = arith.constant 1 : i32
    %4 = arith.minsi %3, %c1_i32 : i32
    %5 = arith.muli %arg1, %4 : i32
    %c1_i32_0 = arith.constant 1 : i32
    %6 = arith.subi %c1_i32_0, %4 : i32
    %c0_i32 = arith.constant 0 : i32
    %7 = arith.muli %c0_i32, %6 : i32
    %8 = arith.addi %5, %7 : i32
    %c0_i32_1 = arith.constant 0 : i32
    %c0_i32_2 = arith.constant 0 : i32
    return %1, %8, %c0_i32_1 : i32, i32, i32
  }
  func.func @transform_5(%arg0: i32, %arg1: i32, %arg2: memref<10xi32, #tpu.memory_space<smem>>, %arg3: memref<10xi32, #tpu.memory_space<smem>>) -> (i32, i32, i32) {
    %0 = arith.index_cast %arg0 : i32 to index
    %1 = memref.load %arg2[%0] : memref<10xi32, #tpu.memory_space<smem>>
    %c0_i32 = arith.constant 0 : i32
    %c0_i32_0 = arith.constant 0 : i32
    %c0_i32_1 = arith.constant 0 : i32
    return %1, %c0_i32, %c0_i32_0 : i32, i32, i32
  }
  func.func @transform_6(%arg0: i32, %arg1: i32, %arg2: memref<10xi32, #tpu.memory_space<smem>>, %arg3: memref<10xi32, #tpu.memory_space<smem>>) -> (i32, i32) {
    %c0_i32 = arith.constant 0 : i32
    %c0_i32_0 = arith.constant 0 : i32
    return %arg0, %c0_i32 : i32, i32
  }
}

</mosaic_0001>

<bundles_post_ra>
// kernel: tpu_custom_call.1
= control target key start
LH: loop header
LB: loop body
LE: loop exit
PB: predicated region body
PF: predicated region fallthrough
CT: control target
= control target key end

     0   :  { %s1322_s0 = inlined_call_operand.vmem [shape: s32[10], index: 0, kind: input, shape index: {}]   ;;  %s1323_s2 = inlined_call_operand.vmem [shape: bf16[160,32], index: 2, kind: input, shape index: {}]   ;;  %s1324_s3 = inlined_call_operand.vmem [shape: f32[160,1], index: 3, kind: input, shape index: {}]   ;;  %s1325_s4 = inlined_call_operand.vmem [shape: bf16[8,32,256], index: 4, kind: input, shape index: {}]   ;;  %s1326_s5 = inlined_call_operand.vmem [shape: f32[8,1,256], index: 5, kind: input, shape index: {}]   ;;  %s1327_s6 = inlined_call_operand.vmem [shape: bf16[8,256,32], index: 6, kind: input, shape index: {}]   ;;  %s1328_s7 = inlined_call_operand.vmem [shape: f32[8,1,32], index: 7, kind: input, shape index: {}]   ;;  %s1329_s8 = inlined_call_operand.vmem [shape: bf16[160,32], index: 8, kind: output, shape index: {}]   ;;  %s1330_s1 = inlined_call_operand.vmem [shape: s32[10], index: 1, kind: input, shape index: {}]  }
   0x1   :  { %s13_s29 = sshll.u32 %s1322_s0, 4  ;;  %s17_s10 = sshll.u32 %s1330_s1, 4  ;;  %s14_s29 = int_to_ptr.vmem [resolvable:$true] %s13_s29  ;;  %s18_s10 = int_to_ptr.vmem [resolvable:$true] %s17_s10 }
   0x2   :  { %s1126_s11 = scalar_lea.vmem %s14_s29, 16  ;;  %p1131_p1 = scmp.lt.s32.totalorder %s14_s29, %s14_s29 }
   0x3   :  { %p1127_p0 = scmp.ne.s32.totalorder %s14_s29, %s1126_s11  ;;  %p1132_p2 = scmp.lt.s32.totalorder %s1126_s11, %s1126_s11 }
   0x5   :  { %p1133_p3 = por %p1132_p2, %p1131_p1 }
   0x7   :  { %p1134_p4 = pnand %p1133_p3, %p1127_p0 }
   0x9   :  { %1137 = shalt.err (!%p1134_p4)  }
   0xa   :  { %s1176_s12 = smov [#allocation3]   ;;  %s1138_s13 = scalar_lea.vmem %s18_s10, 16 }
   0xb   :  { %16 = dma.vmem_to_smem %s14_s29, 16, %s1176_s12, [#allocation2] }
   0xc   :  { %p1139_p5 = scmp.ne.s32.totalorder %s18_s10, %s1138_s13  ;;  %p1143_p6 = scmp.lt.s32.totalorder %s18_s10, %s18_s10 }
   0xd   :  { %p1144_p7 = scmp.lt.s32.totalorder %s1138_s13, %s1138_s13 }
   0xf   :  { %p1145_p8 = por %p1144_p7, %p1143_p6 }
  0x11   :  { %p1146_p9 = pnand %p1145_p8, %p1139_p5 }
  0x13   :  { %1149 = shalt.err (!%p1146_p9)  }
  0x14   :  { %s1177_s0 = smov [#allocation4]  }
  0x15   :  { %20 = dma.vmem_to_smem %s18_s10, 16, %s1177_s0, [#allocation2] }
  0x16   :  { %1162 = dma.done.wait [#allocation2], 32 }
  0x17   :  { %1163 = vsyncadd [#allocation2], 4294967264 }
  0x18   :  { %22 = sfence }
  0x19   :  { %s1231_s1 = smov 0   ;;  %s1233_s14 = smov 0  }
  0x1a   :  { %s1235_s15 = smov 0  }
  0x1b LB: > { %s40_s16 = sadd.s32 1, %s1170_s14  ;;  %p999_p10 = scmp.ge.s32.totalorder %s1174_s15, 1  ;;  %s1174_s15 = sphi %s1235_s15, %s28_s15   ;;  %s1170_s14 = sphi %s1233_s14, %s1332_s14   ;;  %s1166_s1 = sphi %s1231_s1, %s1331_s1  }
  0x1c   : > { %p42_p11 = scmp.ge.s32.totalorder %s40_s16, 10  ;;  %p370_p12 = scmp.lt.s32.totalorder %s1174_s15, 11 }
  0x1e   : > { %s1334_s16 = smov (%p42_p11, %s40_s16), 0  ;;  %p371_p13 = pnand %p999_p10, %p370_p12 }
  0x1f   : > { %s1000_s17 = sshll.u32 (!%p371_p13), %s1166_s1, 1  ;;  %s462_s18 = sld [smem:[#allocation3 + %s1166_s1]] (!%p371_p13) }
  0x20   : > { %374 = sbr.rel (%p371_p13) target bundleno = 530 (0x212), region = 44  ;;  %p451_p0 = scmp.lt.s32.totalorder (!%p371_p13), %s1000_s17, 19 }
  0x21   : > { %s482_s19 = sld [smem:[#allocation3 + %s1166_s1]] (!%p371_p13) }
  0x22   : > { %s501_s20 = sld [smem:[#allocation3 + %s1166_s1]] (!%p371_p13) }
  0x23   : > { %s521_s21 = sld [smem:[#allocation3 + %s1166_s1]] (!%p371_p13) }
  0x24   : > { %s1249_s22 = sld [smem:[#allocation4 + %s1166_s1]] (!%p371_p13) }
  0x25   : > { %p468_p1 = scmp.lt.s32.totalorder (!%p371_p13), %s462_s18, 7 }
  0x27   : > { %s1336_s17 = smov (!%p451_p0, %s1000_s17), 19  ;;  %p488_p2 = scmp.lt.s32.totalorder %s482_s19, 7 }
  0x28   : > { %s1001_s23 = sshll.u32 %s1336_s17, 2  ;;  %s1003_s24 = sshll.u32 %s1336_s17, 3 }
  0x29   : > { %s454_s27 = scalar_lea.vmem %s1323_s2, %s1001_s23  ;;  %s1257_s30 = scalar_lea.vmem %s1324_s3, %s1003_s24 }
  0x2a   : > { %p507_p3 = scmp.lt.s32.totalorder %s501_s20, 7  ;;  %p522_p4 = scmp.lt.s32.totalorder %s521_s21, 7 }
  0x2b   : > { %s1338_s18 = smov (!%p468_p1, %s462_s18), 7  ;;  %s1340_s19 = smov (!%p488_p2, %s482_s19), 7 }
  0x2c   : > { %s1040_s9 = sshll.u32 %s1338_s18, 5  ;;  %s1262_s12 = scalar_lea.vmem %s1329_s8, %s1001_s23 }
  0x2d   : > { %s475_s1 = scalar_lea.vmem %s1325_s4, %s1040_s9  ;;  %s1006_s17 = sshll.u32 %s1340_s19, 1 }
  0x2e   : > { %s1270_s26 = scalar_lea.vmem %s1326_s5, %s1006_s17  ;;  %s1342_s20 = smov (!%p507_p3, %s501_s20), 7 }
  0x2f   : > { %s1344_s21 = smov (!%p522_p4, %s521_s21), 7  ;;  %s1041_s18 = sshll.u32 %s1342_s20, 7 }
  0x30   : > { %s1277_s23 = scalar_lea.vmem %s1327_s6, %s1041_s18  ;;  %s524_s9 = scalar_lea.vmem %s1328_s7, %s1344_s21 }
  0x31   : > { %p1011_p5 = scmp.le.s32.totalorder %s1249_s22, 0 }
  0x32   : > { %v1095_v0 = vld [vmem:[%s475_s1 + $0x4] ss:$8 sps:$4 sm:$0xff] (!%p1011_p5)   ;;  %v1097_v1 = vld [vmem:[%s475_s1] ss:$8 sps:$4 sm:$0xff] (!%p1011_p5)   ;;  %v1178_v2 = vmov (!%p1011_p5), 0   ;;  %vm581_vm0 = vcmask (!%p1011_p5), 261120   ;;  %v546_v24 = vlaneseq (!%p1011_p5) }
  0x33   : > { %537 = sbr.rel (%p1011_p5) target bundleno = 521 (0x209), region = 48  ;;  %617 = vmatprep.mubr.bf16.mxu0 (!%p1011_p5), %v1178_v2  ;;  %1094 = vset.pattern.permute.xlu0 (!%p1011_p5), %v1178_v2  ;;  %v1098_v3 = vld [vmem:[%s475_s1 + $0x14] ss:$8 sps:$4 sm:$0xff] (!%p1011_p5)   ;;  %v1100_v4 = vld [vmem:[%s475_s1 + $0x10] ss:$8 sps:$4 sm:$0xff] (!%p1011_p5)   ;;  %v1101_v5 = vld [vmem:[%s454_s27] sm:$0xff] (!%p1011_p5)  }
  0x34   : > { %585 = vmatprep.subr.bf16.mxu0 (!%p1011_p5), %v1095_v0  ;;  %v1102_v6 = vld [vmem:[%s1277_s23 + $0x40] sm:$0xff] (!%p1011_p5)   ;;  %v1104_v8 = vld [vmem:[%s1277_s23 + $0x48] sm:$0xff] (!%p1011_p5)   ;;  %v1106_v10 = vld [vmem:[%s1277_s23 + $0x50] sm:$0xff] (!%p1011_p5)   ;;  %v547_v25 = vshrl.u32 (!%p1011_p5), %v546_v24, 7  ;;  %vm848_vm1 = vcmask (!%p1011_p5), 257024  }
  0x35   : > { %586 = vmatpush1.bf16.msra.mxu0 (!%p1011_p5), %v1097_v1  ;;  %v1103_v7 = vld [vmem:[%s1277_s23] sm:$0xff] (!%p1011_p5)   ;;  %1044 = vmatprep.subr.bf16.mxu1 (!%p1011_p5), %v1102_v6  ;;  %v1105_v9 = vld [vmem:[%s1277_s23 + $0x8] sm:$0xff] (!%p1011_p5)   ;;  %v1107_v11 = vld [vmem:[%s1277_s23 + $0x10] sm:$0xff] (!%p1011_p5)  }
  0x36   : > { %587 = vmatprep.subr.bf16.mxu0 (!%p1011_p5), %v1098_v3  ;;  %1045 = vmatpush3.bf16.msra.mxu1 (!%p1011_p5), %v1103_v7  ;;  %v1108_v12 = vld [vmem:[%s1277_s23 + $0x58] sm:$0xff] (!%p1011_p5)   ;;  %v1110_v14 = vld [vmem:[%s1277_s23 + $0x60] sm:$0xff] (!%p1011_p5)   ;;  %v1112_v16 = vld [vmem:[%s1277_s23 + $0x68] sm:$0xff] (!%p1011_p5)   ;;  %v548_v26 = vsub.s32 (!%p1011_p5), 0, %v547_v25  ;;  %v552_v28 = vsub.s32 (!%p1011_p5), 1, %v547_v25 }
  0x37   : > { %1046 = vmatprep.subr.bf16.mxu1 (!%p1011_p5), %v1104_v8  ;;  %v1109_v13 = vld [vmem:[%s1277_s23 + $0x18] sm:$0xff] (!%p1011_p5)   ;;  %v1111_v15 = vld [vmem:[%s1277_s23 + $0x20] sm:$0xff] (!%p1011_p5)   ;;  %v1113_v17 = vld [vmem:[%s1277_s23 + $0x28] sm:$0xff] (!%p1011_p5)  }
  0x38   : > { %v1114_v18 = vld [vmem:[%s1277_s23 + $0x70] sm:$0xff] (!%p1011_p5)   ;;  %v1116_v20 = vld [vmem:[%s1277_s23 + $0x78] sm:$0xff] (!%p1011_p5)   ;;  %v826_v22 = vld [vmem:[%s1257_s30] sm:$0xff] (!%p1011_p5) }
  0x39   : > { %588 = vmatpush1.bf16.msra.mxu0 (!%p1011_p5), %v1100_v4  ;;  %v1115_v19 = vld [vmem:[%s1277_s23 + $0x30] sm:$0xff] (!%p1011_p5)   ;;  %v1117_v21 = vld [vmem:[%s1277_s23 + $0x38] sm:$0xff] (!%p1011_p5)   ;;  %830 = vperm.xlu0 (!%p1011_p5), %1094, %v826_v22   ;;  %v827_v23 = vld [vmem:[%s1257_s30 + $0x8] sm:$0xff] (!%p1011_p5) }
  0x3a   : > { %1047 = vmatpush3.bf16.msra.mxu1 %v1105_v9  ;;  %v544_v27 = vld [vmem:[%s1270_s26] sm:$0x3] }
  0x3b   : > { %1048 = vmatprep.subr.bf16.mxu1 %v1106_v10  ;;  %v549_v29 = vrot.slane %v544_v27, %v548_v26  ;;  %v553_v30 = vrot.slane %v544_v27, %v552_v28  ;;  %v1018_v63 = vld [vmem:[%s524_s9] ss:$0 sm:$0xff] }
  0x3c   : > { %1017 = vmatmul.mubr.msk.bf16.vlgmr.msra.gmra.mrb[0].mxu0 %vm581_vm0, %v1101_v5 }
  0x3d   : > { %835 = vperm.xlu0 %1094, %v827_v23  }
  0x3e   : > { %1049 = vmatpush3.bf16.msra.mxu1 %v1107_v11 }
  0x3f   : > { %1050 = vmatprep.subr.bf16.mxu1 %v1108_v12 }
  0x42   : > { %1051 = vmatpush3.bf16.msra.mxu1 %v1109_v13 }
  0x43   : > { %1052 = vmatprep.subr.bf16.mxu1 %v1110_v14 }
  0x46   : > { %1053 = vmatpush3.bf16.msra.mxu1 %v1111_v15 }
  0x47   : > { %1054 = vmatprep.subr.bf16.mxu1 %v1112_v16 }
  0x4a   : > { %1055 = vmatpush3.bf16.msra.mxu1 %v1113_v17 }
  0x4b   : > { %1056 = vmatprep.subr.bf16.mxu1 %v1114_v18 }
  0x4e   : > { %1057 = vmatpush3.bf16.msra.mxu1 %v1115_v19 }
  0x4f   : > { %1058 = vmatprep.subr.bf16.mxu1 %v1116_v20 }
  0x52   : > { %1059 = vmatpush3.bf16.msra.mxu1 %v1117_v21 }
  0xb8   : > { %v831_v62 = vpop.permute.xlu0 %830 }
  0xbc   : > { %v836_v8 = vpop.permute.xlu0 %835 }
 0x10f   : > { %v619_v31 = vpop.f32.mrb[0].mxu0 }
 0x110   : > { %v620_v32 = vadd.f32 %v619_v31, %v549_v29  ;;  %v621_v33 = vpop.f32.mrb[1].mxu0 }
 0x111   : > { %v622_v34 = vadd.f32 %v621_v33, %v553_v30  ;;  %v623_v35 = vpop.f32.mrb[2].mxu0 }
 0x112   : > { %v632_v36 = vmul.f32 0.70710677, %v620_v32  ;;  %v624_v37 = vadd.f32 %v623_v35, %v549_v29  ;;  %v625_v38 = vpop.f32.mrb[3].mxu0  ;;  %v628_v49 = vmul.f32 0.5, %v620_v32 }
 0x113   : > { %v633_v39 = vmul.f32 0.70710677, %v622_v34  ;;  %v626_v40 = vadd.f32 %v625_v38, %v553_v30  ;;  %v629_v52 = vmul.f32 0.5, %v622_v34 }
 0x114   : > { %1118 = verf.f32 %v632_v36  ;;  %v634_v41 = vmul.f32 0.70710677, %v624_v37  ;;  %v630_v50 = vmul.f32 0.5, %v624_v37 }
 0x115   : > { %1120 = verf.f32 %v633_v39  ;;  %v635_v42 = vmul.f32 0.70710677, %v626_v40  ;;  %v631_v53 = vmul.f32 0.5, %v626_v40 }
 0x116   : > { %1122 = verf.f32 %v634_v41 }
 0x117   : > { %1124 = verf.f32 %v635_v42 }
 0x11e   : > { %v1119_v43 = vpop.eup %1118 }
 0x11f   : > { %v1121_v44 = vpop.eup %1120  ;;  %v640_v45 = vadd.f32 1.0, %v1119_v43 }
 0x120   : > { %v1123_v46 = vpop.eup %1122  ;;  %v641_v47 = vadd.f32 1.0, %v1121_v44 }
 0x121   : > { %v1125_v48 = vpop.eup %1124  ;;  %v642_v51 = vadd.f32 1.0, %v1123_v46  ;;  %v644_v55 = vmul.f32 %v640_v45, %v628_v49 }
 0x122   : > { %v643_v54 = vadd.f32 1.0, %v1125_v48  ;;  %v645_v57 = vmul.f32 %v641_v47, %v629_v52 }
 0x123   : > { %v646_v56 = vmul.f32 %v642_v51, %v630_v50 }
 0x124   : > { %v647_v58 = vmul.f32 %v643_v54, %v631_v53 }
 0x125   : > { %v648_v59 = vpack.c.bf16 %v646_v56, %v644_v55 }
 0x126   : > { %v649_v60 = vpack.c.bf16 %v647_v58, %v645_v57 }
 0x128   : > { %817 = vmatprep.mubr.bf16.mxu1 %v649_v60 }
 0x129   : > { %818 = vmatmul.mubr.bf16.vlgmr.msra.gmra.mrb[0].mxu1 %v648_v59 }
 0x1fc   : > { %v1060_v61 = vpop.f32.mrb[0].mxu1 }
 0x1fd   : > { %v1061_v0 = vpop.f32.mrb[1].mxu1 }
 0x1fe   : > { %v1062_v1 = vadd.f32 %v1061_v0, %v1060_v61  ;;  %v1063_v2 = vpop.f32.mrb[2].mxu1 }
 0x1ff   : > { %v1064_v3 = vpop.f32.mrb[3].mxu1 }
 0x200   : > { %v820_v4 = vadd.f32 %v1062_v1, %v1018_v63  ;;  %v1065_v5 = vadd.f32 %v1064_v3, %v1063_v2 }
 0x202   : > { %v838_v6 = vmul.f32 %v831_v62, %v820_v4  ;;  %v823_v7 = vadd.f32 %v1065_v5, %v1018_v63 }
 0x204   : > { %v1042_v9 = vpack.c.bf16 %v838_v6, %v838_v6  ;;  %v839_v10 = vmul.f32 %v836_v8, %v823_v7 }
 0x206   : > { %849 = vst.msk [vmem:[%s1262_s12] sm:$0xf] %vm848_vm1, %v1042_v9  ;;  %v1043_v11 = vpack.c.bf16 %v839_v10, %v839_v10 }
 0x208   : > { %850 = vst.msk [vmem:[%s1262_s12 + $0x4] sm:$0xf] %vm848_vm1, %v1043_v11 }
 0x209 PF: > { %p1037_p6 = scmp.gt.s32.totalorder %s1249_s22, 0 }
 0x20a   : > { %vm855_vm2 = vcmask (!%p1037_p6), 257024   ;;  %v1179_v12 = vmov (!%p1037_p6), 0  }
 0x20b   : > { %854 = sbr.rel (%p1037_p6) target bundleno = 530 (0x212), region = 52  ;;  %856 = vst.msk [vmem:[%s1262_s12] sm:$0xf] (!%p1037_p6), %vm855_vm2, %v1179_v12  ;;  %857 = vst.msk [vmem:[%s1262_s12 + $0x4] sm:$0xf] (!%p1037_p6), %vm855_vm2, %v1179_v12 }
 0x212 PF: > { %s28_s15 = sadd.s32 1, %s1174_s15   ;;  %s1331_s1 = smov %s1170_s14 }
 0x213   : > { %p25_p7 = scmp.ge.s32.totalorder %s28_s15, 12   ;;  %s1332_s14 = smov %s1334_s16 }
 0x215   :  { %27 = sbr.rel (!%p25_p7) target bundleno = 27 (0x1b), region = 97 }

</bundles_post_ra>
